<compile_context>
chip_gen: v6e
topology: v6e:2x2x1
jax: 0.10.0
libtpu: 0.0.40
codegen_flags: <defaults>
</compile_context>

<pallas_src>
import jax
import jax.numpy as jnp
from jax.experimental import pallas as pl
from jax.experimental.pallas import tpu as pltpu

LANE = 128
_VMEM_LIMIT = 48 * 1024 * 1024


# ---------------------------------------------------------------------------
# small helpers
# ---------------------------------------------------------------------------
def _round_up(x, m):
    return (x + m - 1) // m * m


def _pad_axis(x, target, axis):
    pad = target - x.shape[axis]
    if pad <= 0:
        return x
    widths = [(0, 0)] * x.ndim
    widths[axis] = (0, pad)
    return jnp.pad(x, widths)


def _pick_tm(M, max_tm=512):
    # Largest row tile (multiple of 8) dividing M; prefer >= 2 grid steps so
    # both TensorCores are used on v7x.
    cands = [t for t in (512, 256, 128, 64, 32, 16, 8) if t <= max_tm]
    for tm in cands:
        if M % tm == 0 and M // tm >= 2:
            return tm
    for tm in cands:
        if M % tm == 0:
            return tm
    return M


# ---------------------------------------------------------------------------
# Kernel 1: conv1 (3x3, stride 2) + BN1 + ReLU   and   shortcut (1x1, s2) + BN
# one MXU pass over the concatenated folded weights.
# ---------------------------------------------------------------------------
def _conv1_shortcut_kernel(x_ref, w_ref, b_ref, h_ref, sc_ref):
    # bf16 x bf16 -> f32 accumulation on the MXU
    acc = jnp.dot(x_ref[...], w_ref[...], preferred_element_type=jnp.float32)
    y = acc + b_ref[...]                    # folded BN shift (+ conv bias), f32
    cp = h_ref.shape[-1]
    h_ref[...] = jnp.maximum(y[:, :cp], 0.0).astype(h_ref.dtype)   # relu(bn1(conv1))
    sc_ref[...] = y[:, cp:].astype(sc_ref.dtype)                   # bn_sc(conv_sc)


def conv1_shortcut(patches, w_cat, shift_cat, cp):
    """patches: (M, Kp) bf16;  w_cat: (Kp, 2*cp) bf16;  shift_cat: (1, 2*cp) f32."""
    M, Kp = patches.shape
    tm = _pick_tm(M)
    return pl.pallas_call(
        _conv1_shortcut_kernel,
        out_shape=(jax.ShapeDtypeStruct((M, cp), jnp.bfloat16),
                   jax.ShapeDtypeStruct((M, cp), jnp.float32)),
        grid_spec=pltpu.PrefetchScalarGridSpec(
            num_scalar_prefetch=0,
            grid=(M // tm,),
            in_specs=[
                pl.BlockSpec((tm, Kp), lambda i: (i, 0)),
                # grid-invariant (resident) weight / shift blocks
                pl.BlockSpec((Kp, 2 * cp), lambda i: (0, 0)),
                pl.BlockSpec((1, 2 * cp), lambda i: (0, 0)),
            ],
            out_specs=[
                pl.BlockSpec((tm, cp), lambda i: (i, 0)),
                pl.BlockSpec((tm, cp), lambda i: (i, 0)),
            ],
        ),
        compiler_params=pltpu.CompilerParams(
            dimension_semantics=("parallel",),
            vmem_limit_bytes=_VMEM_LIMIT),
    )(patches, w_cat, shift_cat)


# ---------------------------------------------------------------------------
# Kernel 2: conv2 (3x3, stride 1, pad 1) + BN2 + ReLU + residual add + ReLU
# In-kernel patch construction: nine shifted taps of the padded activation,
# accumulated as nine matmuls (no im2col materialization in HBM).
# ---------------------------------------------------------------------------
def _conv2_residual_kernel(h_ref, w_ref, b_ref, sc_ref, o_ref):
    # h_ref : (1, OH+2, OW+2, Cp)  bf16 (zero-padded conv1 activation, 1 image)
    # w_ref : (9, Cp, Cp)          bf16 (BN2 scale folded into columns)
    # b_ref : (1, Cp)              f32
    # sc_ref: (1, OH*OW, Cp)       f32  (shortcut, already BN-folded)
    # o_ref : (1, OH*OW, Cp)       f32
    hp = h_ref[0].astype(jnp.float32)        # f32: cheapest sublane slicing/reshape
    ohp, owp, cp = hp.shape
    oh, ow = ohp - 2, owp - 2
    acc = jnp.zeros((oh * ow, cp), jnp.float32)
    t = 0
    for i in range(3):                       # static, fully unrolled 3x3 tap loop
        for j in range(3):
            tap = hp[i:i + oh, j:j + ow, :].reshape(oh * ow, cp)
            acc = acc + jnp.dot(tap.astype(jnp.bfloat16), w_ref[t],
                                preferred_element_type=jnp.float32)
            t += 1
    y = jnp.maximum(acc + b_ref[...], 0.0)   # relu(bn2(conv2(h1)))
    y = y + sc_ref[0]                        # + shortcut
    o_ref[0] = jnp.maximum(y, 0.0).astype(o_ref.dtype)


def conv2_residual(h1_padded, w2_taps, shift2, shortcut):
    N, OHP, OWP, Cp = h1_padded.shape
    OH, OW = OHP - 2, OWP - 2
    M = OH * OW
    return pl.pallas_call(
        _conv2_residual_kernel,
        out_shape=jax.ShapeDtypeStruct((N, M, Cp), jnp.float32),
        grid_spec=pltpu.PrefetchScalarGridSpec(
            num_scalar_prefetch=0,
            grid=(N,),                       # N images -> >= 2 parallel steps
            in_specs=[
                pl.BlockSpec((1, OHP, OWP, Cp), lambda n: (n, 0, 0, 0)),
                pl.BlockSpec((9, Cp, Cp), lambda n: (0, 0, 0)),
                pl.BlockSpec((1, Cp), lambda n: (0, 0)),
                pl.BlockSpec((1, M, Cp), lambda n: (n, 0, 0)),
            ],
            out_specs=pl.BlockSpec((1, M, Cp), lambda n: (n, 0, 0)),
        ),
        compiler_params=pltpu.CompilerParams(
            dimension_semantics=("parallel",),
            vmem_limit_bytes=_VMEM_LIMIT),
    )(h1_padded, w2_taps, shift2, shortcut)


# ---------------------------------------------------------------------------
# Glue: im2col (conv1 only), BN folding, padding  (plain JAX data plumbing)
# ---------------------------------------------------------------------------
def im2col(x_nhwc, kh, kw, stride, pad):
    N, H, W, C = x_nhwc.shape
    xp = jnp.pad(x_nhwc, ((0, 0), (pad, pad), (pad, pad), (0, 0)))
    OH = (H + 2 * pad - kh) // stride + 1
    OW = (W + 2 * pad - kw) // stride + 1
    cols = []
    for i in range(kh):
        for j in range(kw):
            cols.append(xp[:, i:i + stride * OH:stride, j:j + stride * OW:stride, :])
    patches = jnp.concatenate(cols, axis=-1)          # (N, OH, OW, kh*kw*C)
    return patches.reshape(N * OH * OW, kh * kw * C), (N, OH, OW)


def _fold_bn(conv_bias, gamma, beta, rmean, rvar, eps=1e-5):
    scale = gamma / jnp.sqrt(rvar + eps)
    shift = beta + (conv_bias - rmean) * scale
    return scale, shift


def resblock_forward(x_nchw, p):
    """ResBlock(in_ch, out_ch, downsample=True) forward, BN in eval mode."""
    x = jnp.transpose(x_nchw, (0, 2, 3, 1)).astype(jnp.float32)   # NHWC
    Cin = x.shape[-1]
    Cout = p["c1_w"].shape[0]
    Cp = _round_up(Cout, LANE)                       # lane-dense channel padding

    # ---- kernel 1: conv1(3x3,s2)+BN1+ReLU fused with shortcut(1x1,s2)+BN ----
    patches, (N, OH, OW) = im2col(x, 3, 3, 2, 1)     # (M, 9*Cin) f32
    K1 = patches.shape[1]
    K1p = _round_up(K1, LANE)
    patches = _pad_axis(patches, K1p, 1).astype(jnp.bfloat16)

    s1, b1 = _fold_bn(p["c1_b"], p["bn1_g"], p["bn1_b"], p["bn1_m"], p["bn1_v"])
    ssc, bsc = _fold_bn(p["sc_b"], p["bnsc_g"], p["bnsc_b"], p["bnsc_m"], p["bnsc_v"])

    # conv1 weight (Cout,Cin,3,3) -> (9*Cin, Cout), BN1 scale folded into columns
    w1 = jnp.transpose(p["c1_w"], (2, 3, 1, 0)).reshape(K1, Cout) * s1[None, :]
    w1p = jnp.zeros((K1p, Cp), jnp.float32).at[:K1, :Cout].set(w1)

    # shortcut 1x1 weight sits at the centre tap (kh=1, kw=1) of the 3x3 patches
    wsc = jnp.transpose(p["sc_w"], (2, 3, 1, 0)).reshape(Cin, Cout) * ssc[None, :]
    c0 = 4 * Cin                                     # (1*3 + 1) * Cin
    wscp = jnp.zeros((K1p, Cp), jnp.float32).at[c0:c0 + Cin, :Cout].set(wsc)

    w_cat = jnp.concatenate([w1p, wscp], axis=1).astype(jnp.bfloat16)  # (K1p, 2*Cp)
    shift_cat = jnp.concatenate([_pad_axis(b1, Cp, 0), _pad_axis(bsc, Cp, 0)])
    shift_cat = shift_cat.reshape(1, 2 * Cp).astype(jnp.float32)

    h1, shortcut = conv1_shortcut(patches, w_cat, shift_cat, Cp)
    # h1: (M, Cp) bf16 (padded channels are exactly zero);  shortcut: (M, Cp) f32

    # ---- kernel 2: conv2(3x3,s1)+BN2+ReLU + residual + ReLU -----------------
    h1p = jnp.pad(h1.reshape(N, OH, OW, Cp), ((0, 0), (1, 1), (1, 1), (0, 0)))

    s2, b2 = _fold_bn(p["c2_b"], p["bn2_g"], p["bn2_b"], p["bn2_m"], p["bn2_v"])
    w2 = jnp.transpose(p["c2_w"], (2, 3, 1, 0)) * s2[None, None, None, :]  # (3,3,Ci,Co)
    w2_taps = jnp.zeros((9, Cp, Cp), jnp.float32)
    w2_taps = w2_taps.at[:, :Cout, :Cout].set(w2.reshape(9, Cout, Cout))
    w2_taps = w2_taps.astype(jnp.bfloat16)
    shift2 = _pad_axis(b2, Cp, 0).reshape(1, Cp).astype(jnp.float32)

    out = conv2_residual(h1p, w2_taps, shift2, shortcut.reshape(N, OH * OW, Cp))

    out = out.reshape(N, OH, OW, Cp)[..., :Cout]
    return jnp.transpose(out, (0, 3, 1, 2))          # back to NCHW


# ---------------------------------------------------------------------------
# Pure-JAX f32 reference (lax.conv) for correctness checking
# ---------------------------------------------------------------------------
def _conv_nchw(x, w, b, stride, pad):
    y = jax.lax.conv_general_dilated(
        x, w, window_strides=(stride, stride),
        padding=[(pad, pad), (pad, pad)],
        dimension_numbers=("NCHW", "OIHW", "NCHW"))
    return y + b[None, :, None, None]


def _bn_eval(x, g, b, m, v, eps=1e-5):
    return (x - m[None, :, None, None]) / jnp.sqrt(v[None, :, None, None] + eps) \
        * g[None, :, None, None] + b[None, :, None, None]


def resblock_reference(x, p):
    shortcut = _bn_eval(_conv_nchw(x, p["sc_w"], p["sc_b"], 2, 0),
                        p["bnsc_g"], p["bnsc_b"], p["bnsc_m"], p["bnsc_v"])
    h = jax.nn.relu(_bn_eval(_conv_nchw(x, p["c1_w"], p["c1_b"], 2, 1),
                             p["bn1_g"], p["bn1_b"], p["bn1_m"], p["bn1_v"]))
    h = jax.nn.relu(_bn_eval(_conv_nchw(h, p["c2_w"], p["c2_b"], 1, 1),
                             p["bn2_g"], p["bn2_b"], p["bn2_m"], p["bn2_v"]))
    return jax.nn.relu(h + shortcut)


# ---------------------------------------------------------------------------
def _init_params(key, cin, cout):
    ks = jax.random.split(key, 16)
    n = jax.random.normal
    p = {
        "c1_w": 0.1 * n(ks[0], (cout, cin, 3, 3), jnp.float32),
        "c1_b": 0.1 * n(ks[1], (cout,), jnp.float32),
        "c2_w": 0.1 * n(ks[2], (cout, cout, 3, 3), jnp.float32),
        "c2_b": 0.1 * n(ks[3], (cout,), jnp.float32),
        "sc_w": 0.1 * n(ks[4], (cout, cin, 1, 1), jnp.float32),
        "sc_b": 0.1 * n(ks[5], (cout,), jnp.float32),
    }
    for name, k0 in (("bn1", 6), ("bn2", 9), ("bnsc", 12)):
        p[f"{name}_g"] = 1.0 + 0.1 * n(ks[k0], (cout,), jnp.float32)
        p[f"{name}_b"] = 0.1 * n(ks[k0 + 1], (cout,), jnp.float32)
        p[f"{name}_m"] = 0.1 * n(ks[k0 + 2], (cout,), jnp.float32)
        p[f"{name}_v"] = 1.0 + jnp.abs(0.1 * n(ks[k0 + 3], (cout,), jnp.float32))
    return p


if __name__ == "__main__":
    key = jax.random.PRNGKey(0)
    kx, kp = jax.random.split(key)

    in_channels, out_channels = 4, 8
    x = jax.random.normal(kx, (2, in_channels, 16, 16), jnp.float32)  # NCHW
    params = _init_params(kp, in_channels, out_channels)

    out = resblock_forward(x, params)
    out = jax.block_until_ready(out)

    ref = resblock_reference(x, params)
    assert out.shape == ref.shape == (2, out_channels, 8, 8), (out.shape, ref.shape)
    # bf16 MXU operands -> tolerance loosened vs. the f32 reference.
    assert jnp.allclose(out, ref, atol=5e-2, rtol=5e-2), \
        float(jnp.max(jnp.abs(out - ref)))

    print("KERNEL_OK")
</pallas_src>

<mosaic_0001>
module attributes {stable_mosaic.version = 11 : i64} {
  func.func @_conv1_shortcut_kernel(%arg0: i32, %arg1: memref<64x128xbf16, #tpu.memory_space<vmem>>, %arg2: memref<128x256xbf16, #tpu.memory_space<vmem>>, %arg3: memref<1x256xf32, #tpu.memory_space<vmem>>, %arg4: memref<64x128xbf16, #tpu.memory_space<vmem>>, %arg5: memref<64x128xf32, #tpu.memory_space<vmem>>) attributes {dimension_semantics = [#tpu.dimension_semantics<parallel>], iteration_bounds = array<i64: 2>, scalar_prefetch = 0 : i64, scratch_operands = 0 : i64, tpu.core_type = #tpu.core_type<tc>, window_params = [{transform_indices = @transform_0, window_bounds = array<i64: 64, 128>}, {pipeline_mode = #tpu.pipeline_mode<synchronous>, transform_indices = @transform_1, window_bounds = array<i64: 128, 256>}, {pipeline_mode = #tpu.pipeline_mode<synchronous>, transform_indices = @transform_2, window_bounds = array<i64: 1, 256>}, {transform_indices = @transform_3, window_bounds = array<i64: 64, 128>}, {transform_indices = @transform_4, window_bounds = array<i64: 64, 128>}]} {
    %c0 = arith.constant 0 : index
    %c0_0 = arith.constant 0 : index
    %0 = vector.load %arg1[%c0, %c0_0] : memref<64x128xbf16, #tpu.memory_space<vmem>>, vector<64x128xbf16>
    %c0_1 = arith.constant 0 : index
    %c0_2 = arith.constant 0 : index
    %1 = vector.load %arg2[%c0_1, %c0_2] : memref<128x256xbf16, #tpu.memory_space<vmem>>, vector<128x256xbf16>
    %cst = arith.constant dense<0.000000e+00> : vector<64x256xf32>
    %2 = tpu.matmul %0, %1, %cst {dimension_numbers = #tpu.dot_dimension_numbers<[1], [0], [0], [1], [0, 0, 1, 1], [], []>} : vector<64x128xbf16>, vector<128x256xbf16>, vector<64x256xf32> -> vector<64x256xf32>
    %c0_3 = arith.constant 0 : index
    %c0_4 = arith.constant 0 : index
    %3 = vector.load %arg3[%c0_3, %c0_4] : memref<1x256xf32, #tpu.memory_space<vmem>>, vector<1x256xf32>
    %4 = vector.broadcast %3 : vector<1x256xf32> to vector<64x256xf32>
    %5 = arith.addf %2, %4 : vector<64x256xf32>
    %6 = vector.extract_strided_slice %5 {offsets = [0, 0], sizes = [64, 128], strides = [1, 1]} : vector<64x256xf32> to vector<64x128xf32>
    %cst_5 = arith.constant 0.000000e+00 : f32
    %7 = vector.broadcast %cst_5 : f32 to vector<64x128xf32>
    %8 = arith.maximumf %6, %7 : vector<64x128xf32>
    %9 = arith.truncf %8 : vector<64x128xf32> to vector<64x128xbf16>
    %c0_6 = arith.constant 0 : index
    %c0_7 = arith.constant 0 : index
    %10 = vector.load %arg4[%c0_6, %c0_7] : memref<64x128xbf16, #tpu.memory_space<vmem>>, vector<64x128xbf16>
    tpu.vector_store %arg4[%c0_6, %c0_7], %9 {strides = array<i32>} : memref<64x128xbf16, #tpu.memory_space<vmem>>, vector<64x128xbf16>,
    %11 = vector.extract_strided_slice %5 {offsets = [0, 128], sizes = [64, 128], strides = [1, 1]} : vector<64x256xf32> to vector<64x128xf32>
    %c0_8 = arith.constant 0 : index
    %c0_9 = arith.constant 0 : index
    %12 = vector.load %arg5[%c0_8, %c0_9] : memref<64x128xf32, #tpu.memory_space<vmem>>, vector<64x128xf32>
    tpu.vector_store %arg5[%c0_8, %c0_9], %11 {strides = array<i32>} : memref<64x128xf32, #tpu.memory_space<vmem>>, vector<64x128xf32>,
    return
  }
  func.func @transform_0(%arg0: i32) -> (i32, i32) {
    %c0_i32 = arith.constant 0 : i32
    %c0_i32_0 = arith.constant 0 : i32
    return %arg0, %c0_i32 : i32, i32
  }
  func.func @transform_1(%arg0: i32) -> (i32, i32) {
    %c0_i32 = arith.constant 0 : i32
    %c0_i32_0 = arith.constant 0 : i32
    %c0_i32_1 = arith.constant 0 : i32
    return %c0_i32, %c0_i32_0 : i32, i32
  }
  func.func @transform_2(%arg0: i32) -> (i32, i32) {
    %c0_i32 = arith.constant 0 : i32
    %c0_i32_0 = arith.constant 0 : i32
    %c0_i32_1 = arith.constant 0 : i32
    return %c0_i32, %c0_i32_0 : i32, i32
  }
  func.func @transform_3(%arg0: i32) -> (i32, i32) {
    %c0_i32 = arith.constant 0 : i32
    %c0_i32_0 = arith.constant 0 : i32
    return %arg0, %c0_i32 : i32, i32
  }
  func.func @transform_4(%arg0: i32) -> (i32, i32) {
    %c0_i32 = arith.constant 0 : i32
    %c0_i32_0 = arith.constant 0 : i32
    return %arg0, %c0_i32 : i32, i32
  }
}

</mosaic_0001>

<bundles_post_ra>
// kernel: tpu_custom_call.1
= control target key start
LH: loop header
LB: loop body
LE: loop exit
PB: predicated region body
PF: predicated region fallthrough
CT: control target
= control target key end

     0   :  { %10 = vsyncpa [#allocation3], 0  ;;  %s1294_s0 = inlined_call_operand.hbm [shape: bf16[128,128], index: 0, kind: input, shape index: {}]   ;;  %s1295_s1 = inlined_call_operand.hbm [shape: bf16[128,256], index: 1, kind: input, shape index: {}]   ;;  %s1296_s2 = inlined_call_operand.vmem [shape: f32[1,256], index: 2, kind: input, shape index: {}]   ;;  %s1297_s3 = inlined_call_operand.hbm [shape: bf16[128,128], index: 3, kind: output, shape index: {0}]   ;;  %s1298_s4 = inlined_call_operand.hbm [shape: f32[128,128], index: 4, kind: output, shape index: {1}]  }
   0x1   :  { %12 = vsyncpa [#allocation3 + $0x1], 0 }
   0x2   :  { %13 = vsyncpa [#allocation6], 0 }
   0x3   :  { %14 = vsyncpa [#allocation4], 0 }
   0x4   :  { %16 = vsyncpa [#allocation4 + $0x1], 0 }
   0x5   :  { %17 = vsyncpa [#allocation9], 0 }
   0x6   :  { %19 = vsyncpa [#allocation9 + $0x1], 0  ;;  %s1054_s15 = smov 0   ;;  %s1056_s16 = smov 0  }
   0x7   :  { %s1058_s17 = smov 0   ;;  %s1060_s18 = smov 0  }
   0x8 LB: > { %s1075_s19 = sadd.s32 4294967295, %s1014_s18   ;;  %s665_s20 = sadd.s32 4294967294, %s1014_s18   ;;  %s1014_s18 = sphi %s1060_s18, %s1320_s18   ;;  %s1010_s17 = sphi %s1058_s17, %s1319_s17   ;;  %s1006_s16 = sphi %s1056_s16, %s1318_s16   ;;  %s1002_s15 = sphi %s1054_s15, %s1317_s15  }
   0x9   : > { %p45_p0 = scmp.ne.s32.totalorder %s1006_s16, %s1002_s15  ;;  %p1299_p1 = scmp.eq.s32.totalorder %s1075_s19, 0 }
   0xa   : > { %p117_p3 = scmp.eq.s32.totalorder %s665_s20, 1  ;;  %p666_p5 = scmp.ge.s32.totalorder %s1014_s18, 1 }
   0xb   : > { %p1084_p4 = por %p1299_p1, %p45_p0  ;;  %p150_p7 = scmp.lt.s32.totalorder %s1014_s18, 3 }
   0xc   : > { %p1089_p6 = por %p117_p3, %p45_p0  ;;  %s1016_s24 = smov [#allocation5]  }
   0xd   : > { %s1303_s21 = scalar_select %p1084_p4, 1, 0 }
   0xe   : > { %s1304_s22 = scalar_select %p1089_p6, 1, 0 }
   0xf   : > { %p1094_p8 = pnand %p666_p5, %p150_p7  ;;  %s162_s25 = sshll.u32 %s1016_s24, 4  ;;  %s163_s25 = int_to_ptr.vmem [resolvable:$true] %s162_s25 }
  0x10   : > { %s1108_s27 = sadd.s32 1, %s1014_s18   ;;  %s32_s28 = sadd.s32 1, %s1010_s17 }
  0x11   : > { %s1305_s23 = scalar_select %p1094_p8, 1, 0 }
  0x12   : > { %p773_p9 = pneg %p1094_p8  ;;  %s29_s29 = ssub.s32 %s1014_s18, %s1108_s27 }
  0x13   : > { %s873_s30 = scalar_lea.vmem %s163_s25, 2048  ;;  %p881_p5 = scmp.lt.s32.totalorder %s163_s25, %s163_s25 }
  0x14   : > { %p1103_p11 = pnand %p773_p9, %p1299_p1  ;;  %p874_p13 = scmp.ne.s32.totalorder %s163_s25, %s873_s30 }
  0x15   : > { %p882_p7 = scmp.lt.s32.totalorder %s873_s30, %s873_s30 }
  0x16   : > { %p864_p12 = pneg %p1103_p11 }
  0x17   : > { %p883_p10 = por %p882_p7, %p881_p5 }
  0x18   : > { %p876_p0 = pnand %p874_p13, %p864_p12 }
  0x1a   : > { %p877_p3 = pneg %p876_p0 }
  0x1c   : > { %p884_p2 = pnand %p883_p10, %p877_p3 }
  0x1e   : > { %887 = shalt.err (!%p884_p2)
}
  0x1f   : > { %s1017_s5 = smov 128   ;;  %s1018_s6 = smov 8  }
  0x20   : > { %776 = dma.hbm_to_vmem [thread:$0]  (!%p1103_p11), %s1295_s1, 2048, %s163_s25, [#allocation6], %s1017_s5, %s1017_s5, %s1018_s6  }
  0x21   : > { %p30_p9 = scmp.eq.s32.totalorder %s29_s29, 0  ;;  %p39_p12 = scmp.ne.s32.totalorder %s1010_s17, %s1006_s16 }
  0x22   : > { %p40_p10 = scmp.eq.s32.totalorder %s1014_s18, 0  ;;  %p789_p2 = scmp.lt.s32.totalorder %s1014_s18, 2 }
  0x23   : > { %s1125_s9 = scalar_select %p30_p9, %s1010_s17, %s32_s28  }
  0x24   : > { %p41_p13 = por %p40_p10, %p39_p12  ;;  %p1307_p0 = scmp.eq.s32.totalorder %s1075_s19, 1 }
  0x25   : > { %s179_s11 = sand.u32 1, %s1010_s17   ;;  %s713_s12 = sshll.u32 %s1014_s18, 9 }
  0x26   : > { %p1129_p3 = por %p1307_p0, %p39_p12  ;;  %s669_s13 = sshll.u32 %s179_s11, 5 }
  0x27   : > { %s1138_s24 = scalar_lea.hbm %s1294_s0, %s713_s12  ;;  %s183_s25 = scalar_lea.vmem [#allocation2], %s669_s13 }
  0x28   : > { %s1308_s10 = scalar_select %p1129_p3, 1, 0 }
  0x29   : > { %s190_s26 = sshll.u32 %s183_s25, 4  ;;  %p1140_p11 = pnand %p789_p2, %p41_p13  ;;  %s1144_s26 = int_to_ptr.vmem [resolvable:$true] %s190_s26 }
  0x2a   : > { %s1146_s29 = scalar_lea.sflag [#allocation3], %s179_s11  ;;  %s888_s30 = scalar_lea.hbm %s1138_s24, 512 }
  0x2b   : > { %p889_p5 = scmp.ne.s32.totalorder %s1138_s24, %s888_s30  ;;  %p890_p7 = pneg %p1140_p11 }
  0x2c   : > { %s893_s7 = scalar_lea.hbm %s1294_s0, 1024  ;;  %p894_p10 = scmp.lt.s32.totalorder %s1138_s24, %s1294_s0 }
  0x2d   : > { %p891_p9 = pnand %p890_p7, %p889_p5  ;;  %p895_p2 = scmp.lt.s32.totalorder %s893_s7, %s888_s30 }
  0x2f   : > { %p892_p12 = pneg %p891_p9  ;;  %p896_p13 = por %p895_p2, %p894_p10 }
  0x31   : > { %p897_p0 = pnand %p896_p13, %p892_p12 }
  0x33   : > { %900 = shalt.err (!%p897_p0)
}
  0x34   : > { %s901_s11 = scalar_lea.vmem %s1144_s26, 512  ;;  %s1019_s13 = smov [#allocation2]  }
  0x35   : > { %p902_p1 = scmp.ne.s32.totalorder %s1144_s26, %s901_s11  ;;  %s906_s14 = sshll.u32 %s1019_s13, 4  ;;  %s907_s14 = int_to_ptr.vmem [resolvable:$false] %s906_s14 }
  0x36   : > { %s908_s20 = scalar_lea.vmem %s907_s14, 1024  ;;  %p909_p9 = scmp.lt.s32.totalorder %s1144_s26, %s907_s14 }
  0x37   : > { %p904_p6 = pnand %p902_p1, %p890_p7  ;;  %p910_p3 = scmp.lt.s32.totalorder %s908_s20, %s901_s11 }
  0x39   : > { %p905_p5 = pneg %p904_p6  ;;  %p911_p4 = por %p910_p3, %p909_p9 }
  0x3b   : > { %p912_p8 = pnand %p911_p4, %p905_p5 }
  0x3d   : > { %915 = shalt.err (!%p912_p8)
}
  0x3e   : > { %s1020_s25 = smov 64   ;;  %s1021_s30 = smov 4  }
  0x3f   : > { %780 = dma.hbm_to_vmem [thread:$0]  (!%p1140_p11), %s1138_s24, 512, %s1144_s26, %s1146_s29, %s1020_s25, %s1020_s25, %s1021_s30  }
  0x40   : > { %p1310_p1 = scmp.ne.s32.totalorder %s1305_s23, 0 }
  0x41   : > { %s1170_s5 = sand.u32 (!%p1310_p1), 1, %s1006_s16   ;;  %p1311_p4 = scmp.ne.s32.totalorder (!%p1310_p1), %s1303_s21, 0 }
  0x42   : > { %202 = sbr.rel (%p1310_p1) target bundleno = 355 (0x163), region = 32  ;;  %s673_s6 = sshll.u32 (!%p1310_p1), %s1170_s5, 5 }
  0x43   : > { %s205_s7 = scalar_lea.sflag (!%p1310_p1), [#allocation3], %s1170_s5  ;;  %s1176_s8 = scalar_lea.vmem (!%p1310_p1), [#allocation2], %s673_s6 }
  0x47   : > { %985 = dma.done.wait (%p1311_p4), %s205_s7, 512  }
  0x48   : > { %987 = vsyncadd (%p1311_p4), %s205_s7, 4294966784  ;;  %p1312_p6 = scmp.eq.s32.totalorder %s1075_s19, 0 }
  0x4a   : > { %989 = dma.done.wait (%p1312_p6), [#allocation6], 2048   ;;  %p1313_p8 = pmov %p1312_p6 }
  0x4b   : > { %v1022_v0 = vmov 0   ;;  %v834_v1 = vld [vmem:[#allocation5 + $0x74] ss:$8 sps:$4 sm:$0xff]   ;;  %v836_v2 = vld [vmem:[#allocation5 + $0x70] ss:$8 sps:$4 sm:$0xff]   ;;  %v858_v17 = vld [vmem:[%s1176_s8] sm:$0xff]   ;;  %v272_v21 = vlaneseq }
  0x4c   : > { %991 = vsyncadd (%p1313_p8), [#allocation6], 4294965248  ;;  %418 = vmatprep.mubr.bf16.mxu0 %v1022_v0  ;;  %438 = vmatprep.mubr.bf16.mxu1 %v1022_v0  ;;  %v837_v3 = vld [vmem:[#allocation5 + $0x64] ss:$8 sps:$4 sm:$0xff]   ;;  %v839_v4 = vld [vmem:[#allocation5 + $0x60] ss:$8 sps:$4 sm:$0xff]  }
  0x4d   : > { %386 = vmatprep.subr.bf16.mxu0 %v834_v1  ;;  %747 = vmatprep.subr.bf16.mxu1 %v834_v1  ;;  %v840_v5 = vld [vmem:[#allocation5 + $0x54] ss:$8 sps:$4 sm:$0xff]   ;;  %v842_v6 = vld [vmem:[#allocation5 + $0x50] ss:$8 sps:$4 sm:$0xff]   ;;  %v843_v7 = vld [vmem:[#allocation5 + $0x44] ss:$8 sps:$4 sm:$0xff]  }
  0x4e   : > { %387 = vmatpush1.bf16.msra.mxu0 %v836_v2  ;;  %755 = vmatpush1.bf16.msra.mxu1 %v836_v2  ;;  %v845_v8 = vld [vmem:[#allocation5 + $0x40] ss:$8 sps:$4 sm:$0xff]   ;;  %v846_v9 = vld [vmem:[#allocation5 + $0x34] ss:$8 sps:$4 sm:$0xff]   ;;  %v848_v10 = vld [vmem:[#allocation5 + $0x30] ss:$8 sps:$4 sm:$0xff]  }
  0x4f   : > { %388 = vmatprep.subr.bf16.mxu0 %v837_v3  ;;  %748 = vmatprep.subr.bf16.mxu1 %v837_v3  ;;  %v849_v11 = vld [vmem:[#allocation5 + $0x24] ss:$8 sps:$4 sm:$0xff]   ;;  %v851_v12 = vld [vmem:[#allocation5 + $0x20] ss:$8 sps:$4 sm:$0xff]   ;;  %v852_v13 = vld [vmem:[#allocation5 + $0x14] ss:$8 sps:$4 sm:$0xff]  }
  0x50   : > { %v854_v14 = vld [vmem:[#allocation5 + $0x10] ss:$8 sps:$4 sm:$0xff]   ;;  %v855_v15 = vld [vmem:[#allocation5 + $0x4] ss:$8 sps:$4 sm:$0xff]   ;;  %v857_v16 = vld [vmem:[#allocation5] ss:$8 sps:$4 sm:$0xff]  }
  0x51   : > { %v859_v18 = vld [vmem:[%s1176_s8 + $0x10] sm:$0xff]   ;;  %v860_v19 = vld [vmem:[%s1176_s8 + $0x8] sm:$0xff]   ;;  %v861_v20 = vld [vmem:[%s1176_s8 + $0x18] sm:$0xff]   ;;  %v273_v22 = vshrl.u32 %v272_v21, 7  ;;  %s676_s24 = sshll.u32 %s1170_s5, 6  ;;  %s1203_s29 = scalar_lea.vmem [#allocation7], %s673_s6 }
  0x52   : > { %389 = vmatpush1.bf16.msra.mxu0 %v839_v4  ;;  %756 = vmatpush1.bf16.msra.mxu1 %v839_v4  ;;  %v270_v24 = vld [vmem:[%s1296_s2] sm:$0x3]  ;;  %s1194_s26 = scalar_lea.vmem [#allocation8], %s676_s24  ;;  %s534_s12 = sshll.u32 %s1203_s29, 4  ;;  %s1211_s12 = int_to_ptr.vmem [resolvable:$true] %s534_s12 }
  0x53   : > { %390 = vmatprep.subr.bf16.mxu0 %v840_v5  ;;  %749 = vmatprep.subr.bf16.mxu1 %v840_v5  ;;  %v274_v23 = vsub.s32 0, %v273_v22  ;;  %v278_v25 = vsub.s32 1, %v273_v22  ;;  %s550_s28 = sshll.u32 %s1194_s26, 4  ;;  %s723_s11 = sshll.u32 %s1075_s19, 10  ;;  %s1209_s28 = int_to_ptr.vmem [resolvable:$true] %s550_s28 }
  0x54   : > { %s722_s13 = sshll.u32 %s1075_s19, 9  ;;  %s1219_s25 = scalar_lea.hbm %s1298_s4, %s723_s11 }
  0x55   : > { %v275_v26 = vrot.slane %v270_v24, %v274_v23  ;;  %v279_v27 = vrot.slane %v270_v24, %v278_v25  ;;  %s1224_s19 = scalar_lea.hbm %s1297_s3, %s722_s13  ;;  %s521_s7 = scalar_lea.sflag [#allocation9], %s1170_s5 }
  0x56   : > { %391 = vmatpush1.bf16.msra.mxu0 %v842_v6  ;;  %757 = vmatpush1.bf16.msra.mxu1 %v842_v6  ;;  %s916_s8 = scalar_lea.vmem %s1209_s28, 1024  ;;  %p1314_p11 = scmp.ne.s32.totalorder %s1308_s10, 0 }
  0x57   : > { %392 = vmatprep.subr.bf16.mxu0 %v843_v7  ;;  %750 = vmatprep.subr.bf16.mxu1 %v843_v7  ;;  %p917_p3 = scmp.ne.s32.totalorder %s1209_s28, %s916_s8  ;;  %s1023_s21 = smov [#allocation8]  }
  0x58   : > { %s920_s23 = sshll.u32 %s1023_s21, 4  ;;  %s921_s23 = int_to_ptr.vmem [resolvable:$false] %s920_s23 }
  0x59   : > { %p918_p7 = pnand %p917_p3, %p1314_p11  ;;  %s922_s24 = scalar_lea.vmem %s921_s23, 2048 }
  0x5a   : > { %393 = vmatpush1.bf16.msra.mxu0 %v845_v8  ;;  %758 = vmatpush1.bf16.msra.mxu1 %v845_v8  ;;  %p923_p10 = scmp.lt.s32.totalorder %s1209_s28, %s921_s23  ;;  %p924_p2 = scmp.lt.s32.totalorder %s922_s24, %s916_s8 }
  0x5b   : > { %394 = vmatprep.subr.bf16.mxu0 %v846_v9  ;;  %751 = vmatprep.subr.bf16.mxu1 %v846_v9  ;;  %p919_p12 = pneg %p918_p7 }
  0x5c   : > { %p925_p13 = por %p924_p2, %p923_p10 }
  0x5e   : > { %395 = vmatpush1.bf16.msra.mxu0 %v848_v10  ;;  %759 = vmatpush1.bf16.msra.mxu1 %v848_v10  ;;  %p926_p0 = pnand %p925_p13, %p919_p12 }
  0x5f   : > { %396 = vmatprep.subr.bf16.mxu0 %v849_v11  ;;  %752 = vmatprep.subr.bf16.mxu1 %v849_v11 }
  0x62   : > { %397 = vmatpush1.bf16.msra.mxu0 %v851_v12  ;;  %760 = vmatpush1.bf16.msra.mxu1 %v851_v12 }
  0x63   : > { %398 = vmatprep.subr.bf16.mxu0 %v852_v13  ;;  %753 = vmatprep.subr.bf16.mxu1 %v852_v13 }
  0x66   : > { %399 = vmatpush1.bf16.msra.mxu0 %v854_v14  ;;  %761 = vmatpush1.bf16.msra.mxu1 %v854_v14 }
  0x67   : > { %400 = vmatprep.subr.bf16.mxu0 %v855_v15  ;;  %754 = vmatprep.subr.bf16.mxu1 %v855_v15 }
  0x6a   : > { %401 = vmatpush1.bf16.msra.mxu0 %v857_v16  ;;  %762 = vmatpush1.bf16.msra.mxu1 %v857_v16 }
  0x6d   : > { %419 = vmatmul.mubr.bf16.vlgmr.msra.gmra.mxu0 %v858_v17  ;;  %439 = vmatmul.mubr.bf16.vlgmr.msra.gmra.mxu1 %v859_v18 }
  0x6e   : > { %428 = vmatprep.mubr.bf16.mxu0 %v1022_v0  ;;  %448 = vmatprep.mubr.bf16.mxu1 %v1022_v0 }
  0x75   : > { %429 = vmatmul.mubr.bf16.gmra.mxu0 %v860_v19  ;;  %449 = vmatmul.mubr.bf16.gmra.mxu1 %v861_v20 }
 0x12d   : > { %v420_v28 = vpop.f32.mrf.mxu0  ;;  %v440_v29 = vpop.f32.mrf.mxu1 }
 0x12e   : > { %v421_v30 = vadd.f32 %v420_v28, %v275_v26  ;;  %v441_v31 = vadd.f32 %v440_v29, %v275_v26 }
 0x12f   : > { %v422_v32 = vpop.f32.mrf.mxu0  ;;  %v442_v33 = vpop.f32.mrf.mxu1 }
 0x130   : > { %v423_v34 = vadd.f32 %v422_v32, %v279_v27  ;;  %v443_v35 = vadd.f32 %v442_v33, %v279_v27  ;;  %v459_v40 = vmax.f32 %v421_v30, 0.0  ;;  %v463_v41 = vmax.f32 %v441_v31, 0.0 }
 0x131   : > { %v424_v36 = vpop.f32.mrf.mxu0  ;;  %v444_v37 = vpop.f32.mrf.mxu1 }
 0x132   : > { %507 = vst [vmem:[%s1194_s26] sm:$0xff] %v423_v34  ;;  %511 = vst [vmem:[%s1194_s26 + $0x20] sm:$0xff] %v443_v35  ;;  %v425_v38 = vadd.f32 %v424_v36, %v275_v26  ;;  %v445_v39 = vadd.f32 %v444_v37, %v275_v26 }
 0x133   : > { %v426_v42 = vpop.f32.mrf.mxu0  ;;  %v446_v43 = vpop.f32.mrf.mxu1 }
 0x134   : > { %v460_v44 = vmax.f32 %v425_v38, 0.0  ;;  %v464_v45 = vmax.f32 %v445_v39, 0.0  ;;  %v427_v46 = vadd.f32 %v426_v42, %v279_v27  ;;  %v447_v47 = vadd.f32 %v446_v43, %v279_v27 }
 0x135   : > { %v430_v48 = vpop.f32.mrf.mxu0  ;;  %v450_v49 = vpop.f32.mrf.mxu1 }
 0x136   : > { %v727_v50 = vpack.c.bf16 %v460_v44, %v459_v40  ;;  %v737_v51 = vpack.c.bf16 %v464_v45, %v463_v41  ;;  %508 = vst [vmem:[%s1194_s26 + $0x8] sm:$0xff] %v427_v46  ;;  %512 = vst [vmem:[%s1194_s26 + $0x28] sm:$0xff] %v447_v47  ;;  %v431_v52 = vadd.f32 %v430_v48, %v275_v26 }
 0x137   : > { %v451_v53 = vadd.f32 %v450_v49, %v275_v26  ;;  %v432_v54 = vpop.f32.mrf.mxu0  ;;  %v452_v55 = vpop.f32.mrf.mxu1 }
 0x138   : > { %728 = vst [vmem:[%s1203_s29] sm:$0xff] %v727_v50   ;;  %745 = vst [vmem:[%s1203_s29 + $0x10] sm:$0xff] %v737_v51   ;;  %v433_v56 = vadd.f32 %v432_v54, %v279_v27  ;;  %v453_v57 = vadd.f32 %v452_v55, %v279_v27  ;;  %v461_v62 = vmax.f32 %v431_v52, 0.0 }
 0x139   : > { %v434_v58 = vpop.f32.mrf.mxu0  ;;  %v454_v59 = vpop.f32.mrf.mxu1  ;;  %v465_v63 = vmax.f32 %v451_v53, 0.0 }
 0x13a   : > { %509 = vst [vmem:[%s1194_s26 + $0x10] sm:$0xff] %v433_v56  ;;  %513 = vst [vmem:[%s1194_s26 + $0x30] sm:$0xff] %v453_v57  ;;  %v435_v60 = vadd.f32 %v434_v58, %v275_v26  ;;  %v455_v61 = vadd.f32 %v454_v59, %v275_v26 }
 0x13b   : > { %v436_v0 = vpop.f32.mrf.mxu0  ;;  %v456_v1 = vpop.f32.mrf.mxu1 }
 0x13c   : > { %v462_v2 = vmax.f32 %v435_v60, 0.0  ;;  %v466_v3 = vmax.f32 %v455_v61, 0.0  ;;  %v437_v4 = vadd.f32 %v436_v0, %v279_v27  ;;  %v457_v5 = vadd.f32 %v456_v1, %v279_v27 }
 0x13e   : > { %v732_v6 = vpack.c.bf16 %v462_v2, %v461_v62  ;;  %v742_v7 = vpack.c.bf16 %v466_v3, %v465_v63  ;;  %510 = vst [vmem:[%s1194_s26 + $0x18] sm:$0xff] %v437_v4  ;;  %514 = vst [vmem:[%s1194_s26 + $0x38] sm:$0xff] %v457_v5 }
 0x13f   : > { %929 = shalt.err (!%p926_p0)
}
 0x140   : > { %s930_s26 = scalar_lea.hbm %s1219_s25, 1024  ;;  %s934_s14 = scalar_lea.hbm %s1298_s4, 2048 }
 0x141   : > { %p931_p5 = scmp.ne.s32.totalorder %s1219_s25, %s930_s26  ;;  %p935_p4 = scmp.lt.s32.totalorder %s1219_s25, %s1298_s4 }
 0x142   : > { %p936_p6 = scmp.lt.s32.totalorder %s934_s14, %s930_s26 }
 0x143   : > { %p932_p9 = pnand %p931_p5, %p1314_p11 }
 0x144   : > { %p937_p8 = por %p936_p6, %p935_p4 }
 0x145   : > { %p933_p1 = pneg %p932_p9 }
 0x147   : > { %p938_p3 = pnand %p937_p8, %p933_p1 }
 0x149   : > { %941 = shalt.err (!%p938_p3)
}
 0x14a   : > { %s1024_s6 = smov 128   ;;  %s1025_s8 = smov 8   ;;  %744 = vst [vmem:[%s1203_s29 + $0x8] sm:$0xff] %v732_v6   ;;  %746 = vst [vmem:[%s1203_s29 + $0x18] sm:$0xff] %v742_v7  }
 0x14b   : > { %770 = dma.vmem_to_hbm [thread:$0]  (%p1314_p11), %s1209_s28, 1024, %s1219_s25, %s521_s7, %s1024_s6, %s1024_s6, %s1025_s8  }
 0x14c   : > { %s516_s21 = scalar_lea.sflag [#allocation4], %s1170_s5  ;;  %s942_s23 = scalar_lea.vmem %s1211_s12, 512 }
 0x14d   : > { %p943_p7 = scmp.ne.s32.totalorder %s1211_s12, %s942_s23  ;;  %s1026_s24 = smov [#allocation7]  }
 0x14e   : > { %s946_s26 = sshll.u32 %s1026_s24, 4  ;;  %s947_s26 = int_to_ptr.vmem [resolvable:$false] %s946_s26 }
 0x14f   : > { %p944_p12 = pnand %p943_p7, %p1314_p11  ;;  %s948_s11 = scalar_lea.vmem %s947_s26, 1024 }
 0x150   : > { %p949_p2 = scmp.lt.s32.totalorder %s1211_s12, %s947_s26  ;;  %p950_p13 = scmp.lt.s32.totalorder %s948_s11, %s942_s23 }
 0x151   : > { %p945_p10 = pneg %p944_p12 }
 0x152   : > { %p951_p0 = por %p950_p13, %p949_p2 }
 0x154   : > { %p952_p5 = pnand %p951_p0, %p945_p10 }
 0x156   : > { %955 = shalt.err (!%p952_p5)
}
 0x157   : > { %s956_s28 = scalar_lea.hbm %s1224_s19, 512  ;;  %s960_s7 = scalar_lea.hbm %s1297_s3, 1024 }
 0x158   : > { %p957_p9 = scmp.ne.s32.totalorder %s1224_s19, %s956_s28  ;;  %p961_p6 = scmp.lt.s32.totalorder %s1224_s19, %s1297_s3 }
 0x159   : > { %p962_p8 = scmp.lt.s32.totalorder %s960_s7, %s956_s28 }
 0x15a   : > { %p958_p1 = pnand %p957_p9, %p1314_p11 }
 0x15b   : > { %p963_p3 = por %p962_p8, %p961_p6 }
 0x15c   : > { %p959_p4 = pneg %p958_p1 }
 0x15e   : > { %p964_p7 = pnand %p963_p3, %p959_p4 }
 0x160   : > { %967 = shalt.err (!%p964_p7)
}
 0x161   : > { %s1027_s20 = smov 64   ;;  %s1028_s30 = smov 4  }
 0x162   : > { %769 = dma.vmem_to_hbm [thread:$0]  (%p1314_p11), %s1211_s12, 512, %s1224_s19, %s516_s21, %s1027_s20, %s1027_s20, %s1028_s30  }
 0x163 PF: > { %s565_s6 = sand.u32 1, %s1002_s15   ;;  %p1315_p12 = scmp.ne.s32.totalorder %s1304_s22, 0 }
 0x164   : > { %p1316_p10 = scmp.ge.s32.totalorder %s1014_s18, 2  ;;  %s566_s8 = scalar_lea.sflag [#allocation4], %s565_s6 }
 0x166   : > { %p782_p2 = pnand %p1316_p10, %p1315_p12 }
 0x168   : > { %p783_p13 = pneg %p782_p2 }
 0x16a   : > { %993 = dma.done.wait (%p783_p13), %s566_s8, 512  }
 0x16b   : > { %995 = vsyncadd (%p783_p13), %s566_s8, 4294966784  ;;  %s575_s23 = scalar_lea.sflag [#allocation9], %s565_s6 }
 0x16c   : > { %997 = dma.done.wait (%p783_p13), %s575_s23, 1024  }
 0x16d   : > { %999 = vsyncadd (%p783_p13), %s575_s23, 4294966272  ;;  %p22_p11 = scmp.ge.s32.totalorder %s1108_s27, 4   ;;  %s1317_s15 = smov %s1006_s16 }
 0x16e   : > { %s1318_s16 = smov %s1010_s17  ;;  %s1319_s17 = smov %s1125_s9 }
 0x16f   : > { %s1320_s18 = smov %s1108_s27  ;;  %24 = sbr.rel (!%p22_p11) target bundleno = 8 (0x8), region = 98 }
 0x174   :  { %580 = vsyncpa [#allocation3], 1 }
 0x175   :  { %582 = vsyncpa [#allocation3 + $0x1], 1 }
 0x176   :  { %583 = vsyncpa [#allocation6], 1 }
 0x177   :  { %584 = vsyncpa [#allocation4], 1 }
 0x178   :  { %586 = vsyncpa [#allocation4 + $0x1], 1 }
 0x179   :  { %587 = vsyncpa [#allocation9], 1 }
 0x17a   :  { %589 = vsyncpa [#allocation9 + $0x1], 1 }

</bundles_post_ra>
